<compile_context>
chip_gen: v7x
topology: tpu7x:2x2x1
jax: 0.10.0
libtpu: 0.0.40
codegen_flags: <defaults>
</compile_context>

<pallas_src>
import jax
import jax.numpy as jnp
from jax.experimental import pallas as pl
from jax.experimental.pallas import tpu as pltpu


def _round_up(v: int, m: int) -> int:
    return (v + m - 1) // m * m


def _round_down_min(v: int, m: int) -> int:
    # Round v down to a multiple of m, but never below m.
    return max(m, v // m * m)


def _copy_kernel(x_ref, o_ref):
    # Pure memory-bound copy: the chomp already happened in the BlockSpec.
    o_ref[...] = x_ref[...]


def _block_budget_bytes() -> int:
    """Per-block VMEM budget, chosen per TPU generation."""
    kind = ""
    try:
        kind = jax.devices()[0].device_kind.lower()
    except Exception:  # no device info -> conservative default
        pass
    if "v7" in kind:
        return 4 << 20  # 3.2 TB/s HBM makes the fixed per-step cost expensive
    if "v6" in kind:
        return 2 << 20
    return 1 << 20      # v5e & unknown chips: well inside the 16 MiB scoped default


def chomp1d(x: jax.Array, chomp_size: int) -> jax.Array:
    """Equivalent of Chomp1d(chomp_size).forward(x) for x of shape (N, C, L)."""
    N, C, L = x.shape
    L_out = L - chomp_size
    assert L_out > 0, "chomp_size must be smaller than the length axis"

    R = N * C
    x2d = x.reshape(R, L)  # free view of the contiguous (N, C, L) layout
    itemsize = x.dtype.itemsize

    # Dtype-aware minimum tile: (8,128) f32, (16,128) bf16, (32,128) int8/fp8.
    sub_min = max(8, 32 // itemsize)
    lane_min = 128

    budget = _block_budget_bytes()

    # Lane axis: prefer one full-width block (contiguous output writeback, one
    # ragged column); only shrink if even `sub_min` rows would blow the budget.
    lane_full = _round_up(L_out, lane_min)
    bl = min(lane_full,
             _round_down_min(budget // (sub_min * itemsize), lane_min))

    # Row axis: fill the remaining budget.
    rows_full = _round_up(R, sub_min)
    br = min(rows_full,
             _round_down_min(budget // (bl * itemsize), sub_min))

    # Prefer >= 2 row blocks (v7x megacore sharding + overlap of step i+1 input
    # DMA with step i writeback) as long as blocks stay >= 512 KiB.
    if pl.cdiv(R, br) < 2:
        half = _round_up(pl.cdiv(rows_full, 2), sub_min)
        if half < rows_full and half * bl * itemsize >= (512 << 10):
            br = half

    grid = (pl.cdiv(R, br), pl.cdiv(L_out, bl))
    bytes_accessed = 2 * R * L_out * itemsize  # HBM read + write of kept data

    out2d = pl.pallas_call(
        _copy_kernel,
        out_shape=jax.ShapeDtypeStruct((R, L_out), x.dtype),
        grid_spec=pltpu.PrefetchScalarGridSpec(
            num_scalar_prefetch=0,
            grid=grid,
            # Input blocks only cover columns [0, L_out) up to block granularity,
            # so (essentially) none of the chomped tail is moved HBM -> VMEM.
            in_specs=[pl.BlockSpec((br, bl), lambda i, j: (i, j))],
            out_specs=pl.BlockSpec((br, bl), lambda i, j: (i, j)),
        ),
        compiler_params=pltpu.CompilerParams(
            dimension_semantics=("parallel", "parallel"),
        ),
        cost_estimate=pl.CostEstimate(
            flops=0, transcendentals=0, bytes_accessed=bytes_accessed),
    )(x2d)

    return out2d.reshape(N, C, L_out)


if __name__ == "__main__":
    key = jax.random.PRNGKey(0)
    # Small shapes consistent with a TCN intermediate activation: (N, C, L)
    N, C, L = 2, 4, 16
    chomp_size = 3  # e.g. (kernel_size - 1) * dilation = (4 - 1) * 1

    x = jax.random.normal(key, (N, C, L), dtype=jnp.float32)

    out = jax.block_until_ready(chomp1d(x, chomp_size))
    ref = x[:, :, : L - chomp_size]
    assert out.shape == (N, C, L - chomp_size)
    assert jnp.array_equal(out, ref)

    # Exercise the dtype-aware (16,128) min-tile path with bf16 activations.
    xb = x.astype(jnp.bfloat16)
    outb = jax.block_until_ready(chomp1d(xb, chomp_size))
    assert jnp.array_equal(outb, xb[:, :, : L - chomp_size])

    print("KERNEL_OK")
</pallas_src>

<mosaic_0001>
module attributes {stable_mosaic.version = 11 : i64} {
  func.func @_copy_kernel(%arg0: i32, %arg1: i32, %arg2: memref<8x128xf32, #tpu.memory_space<vmem>>, %arg3: memref<8x128xf32, #tpu.memory_space<vmem>>) attributes {dimension_semantics = [#tpu.dimension_semantics<parallel>, #tpu.dimension_semantics<parallel>], iteration_bounds = array<i64: 1, 1>, scalar_prefetch = 0 : i64, scratch_operands = 0 : i64, tpu.core_type = #tpu.core_type<tc>, window_params = [{transform_indices = @transform_0, window_bounds = array<i64: 8, 128>}, {transform_indices = @transform_1, window_bounds = array<i64: 8, 128>}]} {
    %c0 = arith.constant 0 : index
    %c0_0 = arith.constant 0 : index
    %0 = vector.load %arg2[%c0, %c0_0] : memref<8x128xf32, #tpu.memory_space<vmem>>, vector<8x128xf32>
    %c0_1 = arith.constant 0 : index
    %c0_2 = arith.constant 0 : index
    %1 = vector.load %arg3[%c0_1, %c0_2] : memref<8x128xf32, #tpu.memory_space<vmem>>, vector<8x128xf32>
    tpu.vector_store %arg3[%c0_1, %c0_2], %0 {strides = array<i32>} : memref<8x128xf32, #tpu.memory_space<vmem>>, vector<8x128xf32>,
    return
  }
  func.func @transform_0(%arg0: i32, %arg1: i32) -> (i32, i32) {
    %c0_i32 = arith.constant 0 : i32
    return %arg0, %arg1 : i32, i32
  }
  func.func @transform_1(%arg0: i32, %arg1: i32) -> (i32, i32) {
    %c0_i32 = arith.constant 0 : i32
    return %arg0, %arg1 : i32, i32
  }
}

</mosaic_0001>

<bundles_post_ra>
// kernel: tpu_custom_call.1
= control target key start
LH: loop header
LB: loop body
LE: loop exit
PB: predicated region body
PF: predicated region fallthrough
CT: control target
= control target key end

     0   :  { %6 = vsyncpa [#allocation3], 0  ;;  %s124_s0 = inlined_call_operand.hbm [shape: f32[8,16], index: 0, kind: input, shape index: {}]   ;;  %s125_s1 = inlined_call_operand.hbm [shape: f32[8,13], index: 1, kind: output, shape index: {}]  }
   0x1   :  { %7 = vsyncpa [#allocation4], 0  ;;  %s88_s6 = smov [#allocation2]   ;;  %s40_s10 = scalar_lea.hbm %s124_s0, 128 }
   0x2   :  { %s14_s7 = sshll.u32 %s88_s6, 4  ;;  %p41_p0 = scmp.ne.s32.totalorder %s124_s0, %s40_s10  ;;  %s15_s7 = int_to_ptr.vmem [resolvable:$true] %s14_s7 }
   0x3   :  { %p44_p1 = scmp.lt.u32.totalorder %s40_s10, %s124_s0 }
   0x5   :  { %p46_p2 = pnand %p44_p1, %p41_p0 }
   0x7   :  { %49 = shalt.err (!%p46_p2)
}
   0x8   :  { %s50_s15 = scalar_lea.vmem %s15_s7, 128  ;;  %p55_p4 = scmp.lt.s32.totalorder %s15_s7, %s15_s7 }
   0x9   :  { %p51_p3 = scmp.ne.s32.totalorder %s15_s7, %s50_s15  ;;  %p56_p5 = scmp.lt.s32.totalorder %s50_s15, %s50_s15 }
   0xb   :  { %p57_p6 = por %p56_p5, %p55_p4 }
   0xd   :  { %p58_p7 = pnand %p57_p6, %p51_p3 }
   0xf   :  { %61 = shalt.err (!%p58_p7)
}
  0x10   :  { %17 = dma.hbm_to_vmem [thread:$0]  %s124_s0, 128, %s15_s7, [#allocation3]  }
  0x11   :  { %84 = dma.done.wait [#allocation3], 128  }
  0x12   :  { %85 = vsyncadd [#allocation3], 4294967168  ;;  %s89_s18 = smov [#allocation5]   ;;  %v21_v0 = vld [vmem:[#allocation2] sm:$0xff] }
  0x13   :  { %s29_s19 = sshll.u32 %s89_s18, 4  ;;  %22 = vst [vmem:[#allocation5] sm:$0xff] %v21_v0  ;;  %s30_s19 = int_to_ptr.vmem [resolvable:$true] %s29_s19 }
  0x14   :  { %s62_s20 = scalar_lea.vmem %s30_s19, 128  ;;  %p67_p9 = scmp.lt.s32.totalorder %s30_s19, %s30_s19 }
  0x15   :  { %p63_p8 = scmp.ne.s32.totalorder %s30_s19, %s62_s20  ;;  %p68_p10 = scmp.lt.s32.totalorder %s62_s20, %s62_s20 }
  0x17   :  { %p69_p11 = por %p68_p10, %p67_p9 }
  0x19   :  { %p70_p12 = pnand %p69_p11, %p63_p8 }
  0x1b   :  { %73 = shalt.err (!%p70_p12)
}
  0x1c   :  { %s74_s23 = scalar_lea.hbm %s125_s1, 128 }
  0x1d   :  { %p75_p13 = scmp.ne.s32.totalorder %s125_s1, %s74_s23  ;;  %p78_p0 = scmp.lt.u32.totalorder %s74_s23, %s125_s1 }
  0x1f   :  { %p80_p1 = pnand %p78_p0, %p75_p13 }
  0x21   :  { %83 = shalt.err (!%p80_p1)
}
  0x22   :  { %32 = dma.vmem_to_hbm [thread:$0]  %s30_s19, 128, %s125_s1, [#allocation4]  }
  0x23   :  { %86 = dma.done.wait [#allocation4], 128  }
  0x24   :  { %87 = vsyncadd [#allocation4], 4294967168 }
  0x25   :  { %36 = vsyncpa [#allocation3], 1 }
  0x26   :  { %37 = vsyncpa [#allocation4], 1 }

</bundles_post_ra>
